<compile_context>
chip_gen: v7x
topology: tpu7x:2x2x1
jax: 0.10.0
libtpu: 0.0.40
codegen_flags: <defaults>
</compile_context>

<pallas_src>
import jax
import jax.numpy as jnp
from jax.experimental import pallas as pl
from jax.experimental.pallas import tpu as pltpu


def ippo_kernel(x_ref, w1_ref, b1_ref, w2v_ref, b2v_ref, out_ref):
    # hidden = relu(x @ W1 + b1)
    h = jnp.dot(x_ref[...], w1_ref[...], preferred_element_type=jnp.float32)
    h = jnp.maximum(h + b1_ref[...], 0.0)
    # [logits | value] = h @ [W2 | Wv] + [b2 | bv]  (single fused head matmul)
    out = jnp.dot(h, w2v_ref[...], preferred_element_type=jnp.float32) + b2v_ref[...]
    out_ref[...] = out.astype(out_ref.dtype)


def _round_up(x, m):
    return ((x + m - 1) // m) * m


def prepare_params(w1, b1, w2, b2, wv, bv):
    """One-time weight preparation (hoisted out of the per-call path).

    Fuses the policy head [H, O] and value head [H, 1] into a single
    [H, O+1] matrix so the kernel does one lane-contiguous head matmul.
    """
    w2v = jnp.concatenate([w2.astype(jnp.float32), wv.astype(jnp.float32)], axis=1)
    b2v = jnp.concatenate([b2.astype(jnp.float32), bv.astype(jnp.float32)], axis=1)
    return (
        jnp.asarray(w1, jnp.float32),
        jnp.asarray(b1, jnp.float32),
        w2v,
        b2v,
    )


def _choose_tile(B, max_block=1024):
    """Pick (TM, grid_steps).  Small B -> one full-batch block.  Large B ->
    an even number of steps (balanced across v7x's 2 TensorCores), each a
    multiple of 8 rows, with the last block overhanging (masked writes)."""
    if B <= max_block:
        return B, 1
    steps = 2 * pl.cdiv(B, 2 * max_block)           # even step count >= 2
    tm = _round_up(pl.cdiv(B, steps), 8)
    return tm, pl.cdiv(B, tm)


def ippo_forward(x, prepared_params, *, max_block=1024):
    """Returns (logits [B, num_outputs], value [B] flattened like value_function())."""
    w1, b1, w2v, b2v = prepared_params
    B, F = x.shape
    H = w1.shape[1]
    Ov = w2v.shape[1]            # num_outputs + 1 (fused value column)
    O = Ov - 1

    TM, steps = _choose_tile(B, max_block)

    flops = 2 * B * (F * H + H * Ov)
    bytes_accessed = 4 * (x.size + w1.size + b1.size + w2v.size + b2v.size + B * Ov)

    out = pl.pallas_call(
        ippo_kernel,
        out_shape=jax.ShapeDtypeStruct((B, Ov), jnp.float32),
        grid=(steps,),
        in_specs=[
            pl.BlockSpec((TM, F), lambda i: (i, 0)),    # x: tiled over batch
            pl.BlockSpec((F, H), lambda i: (0, 0)),     # W1: VMEM-resident
            pl.BlockSpec((1, H), lambda i: (0, 0)),     # b1
            pl.BlockSpec((H, Ov), lambda i: (0, 0)),    # fused [W2 | Wv]
            pl.BlockSpec((1, Ov), lambda i: (0, 0)),    # fused [b2 | bv]
        ],
        out_specs=pl.BlockSpec((TM, Ov), lambda i: (i, 0)),
        compiler_params=pltpu.CompilerParams(
            dimension_semantics=("parallel",),
            vmem_limit_bytes=32 * 1024 * 1024,
        ),
        cost_estimate=pl.CostEstimate(
            flops=flops, transcendentals=0, bytes_accessed=bytes_accessed),
    )(x, w1, b1, w2v, b2v)

    logits = out[:, :O]
    value = out[:, O]            # value_function() flattens to [-1]
    return logits, value


def init_params(key, input_features, hidden_dim, num_outputs):
    """Deterministic init mimicking nn.Linear shapes (stored transposed: [in, out])."""
    k1, k2, k3, k4, k5, k6 = jax.random.split(key, 6)
    s1 = 1.0 / jnp.sqrt(input_features)
    s2 = 1.0 / jnp.sqrt(hidden_dim)
    w1 = jax.random.uniform(k1, (input_features, hidden_dim), jnp.float32, -s1, s1)
    b1 = jax.random.uniform(k2, (1, hidden_dim), jnp.float32, -s1, s1)
    w2 = jax.random.uniform(k3, (hidden_dim, num_outputs), jnp.float32, -s2, s2)
    b2 = jax.random.uniform(k4, (1, num_outputs), jnp.float32, -s2, s2)
    wv = jax.random.uniform(k5, (hidden_dim, 1), jnp.float32, -s2, s2)
    bv = jax.random.uniform(k6, (1, 1), jnp.float32, -s2, s2)
    return w1, b1, w2, b2, wv, bv


def _reference(x, params):
    w1, b1, w2, b2, wv, bv = params
    h = jnp.maximum(x @ w1 + b1, 0.0)
    return h @ w2 + b2, (h @ wv + bv).reshape(-1)


if __name__ == "__main__":
    # Small shapes consistent with the module's forward:
    # batch=8 observations, input_features=16, hidden_dim=32, num_outputs=8
    B, input_features, hidden_dim, num_outputs = 8, 16, 32, 8

    key = jax.random.PRNGKey(0)
    kx, kp, kx2 = jax.random.split(key, 3)
    x = jax.random.normal(kx, (B, input_features), jnp.float32)
    params = init_params(kp, input_features, hidden_dim, num_outputs)

    # One-time weight preparation (fusion), hoisted out of the forward path.
    prepared = prepare_params(*params)

    logits, value = ippo_forward(x, prepared)
    jax.block_until_ready((logits, value))

    logits_ref, value_ref = _reference(x, params)
    assert logits.shape == (B, num_outputs)
    assert value.shape == (B,)
    assert jnp.allclose(logits, logits_ref, atol=1e-2, rtol=1e-2)
    assert jnp.allclose(value, value_ref, atol=1e-2, rtol=1e-2)

    # Exercise the tiled (grid > 1) batch path with an overhanging last block
    # (B2 not a multiple of the tile -> masked OOB writes on the final step).
    B2 = 1201
    x2 = jax.random.normal(kx2, (B2, input_features), jnp.float32)
    logits2, value2 = ippo_forward(x2, prepared)
    jax.block_until_ready((logits2, value2))
    logits2_ref, value2_ref = _reference(x2, params)
    assert logits2.shape == (B2, num_outputs)
    assert value2.shape == (B2,)
    assert jnp.allclose(logits2, logits2_ref, atol=1e-2, rtol=1e-2)
    assert jnp.allclose(value2, value2_ref, atol=1e-2, rtol=1e-2)

    print("KERNEL_OK")
</pallas_src>

<mosaic_0001>
module attributes {stable_mosaic.version = 11 : i64} {
  func.func @ippo_kernel(%arg0: i32, %arg1: memref<8x16xf32, #tpu.memory_space<vmem>>, %arg2: memref<16x32xf32, #tpu.memory_space<vmem>>, %arg3: memref<1x32xf32, #tpu.memory_space<vmem>>, %arg4: memref<32x9xf32, #tpu.memory_space<vmem>>, %arg5: memref<1x9xf32, #tpu.memory_space<vmem>>, %arg6: memref<8x9xf32, #tpu.memory_space<vmem>>) attributes {dimension_semantics = [#tpu.dimension_semantics<parallel>], iteration_bounds = array<i64: 1>, scalar_prefetch = 0 : i64, scratch_operands = 0 : i64, tpu.core_type = #tpu.core_type<tc>, window_params = [{transform_indices = @transform_0, window_bounds = array<i64: 8, 16>}, {pipeline_mode = #tpu.pipeline_mode<synchronous>, transform_indices = @transform_1, window_bounds = array<i64: 16, 32>}, {pipeline_mode = #tpu.pipeline_mode<synchronous>, transform_indices = @transform_2, window_bounds = array<i64: 1, 32>}, {pipeline_mode = #tpu.pipeline_mode<synchronous>, transform_indices = @transform_3, window_bounds = array<i64: 32, 9>}, {pipeline_mode = #tpu.pipeline_mode<synchronous>, transform_indices = @transform_4, window_bounds = array<i64: 1, 9>}, {transform_indices = @transform_5, window_bounds = array<i64: 8, 9>}]} {
    %c0 = arith.constant 0 : index
    %c0_0 = arith.constant 0 : index
    %0 = vector.load %arg1[%c0, %c0_0] : memref<8x16xf32, #tpu.memory_space<vmem>>, vector<8x16xf32>
    %c0_1 = arith.constant 0 : index
    %c0_2 = arith.constant 0 : index
    %1 = vector.load %arg2[%c0_1, %c0_2] : memref<16x32xf32, #tpu.memory_space<vmem>>, vector<16x32xf32>
    %cst = arith.constant dense<0.000000e+00> : vector<8x32xf32>
    %2 = tpu.matmul %0, %1, %cst {dimension_numbers = #tpu.dot_dimension_numbers<[1], [0], [0], [1], [0, 0, 1, 1], [], []>} : vector<8x16xf32>, vector<16x32xf32>, vector<8x32xf32> -> vector<8x32xf32>
    %c0_3 = arith.constant 0 : index
    %c0_4 = arith.constant 0 : index
    %3 = vector.load %arg3[%c0_3, %c0_4] : memref<1x32xf32, #tpu.memory_space<vmem>>, vector<1x32xf32>
    %4 = vector.broadcast %3 : vector<1x32xf32> to vector<8x32xf32>
    %5 = arith.addf %2, %4 : vector<8x32xf32>
    %cst_5 = arith.constant 0.000000e+00 : f32
    %6 = vector.broadcast %cst_5 : f32 to vector<8x32xf32>
    %7 = arith.maximumf %5, %6 : vector<8x32xf32>
    %c0_6 = arith.constant 0 : index
    %c0_7 = arith.constant 0 : index
    %8 = vector.load %arg4[%c0_6, %c0_7] : memref<32x9xf32, #tpu.memory_space<vmem>>, vector<32x9xf32>
    %cst_8 = arith.constant dense<0.000000e+00> : vector<8x9xf32>
    %9 = tpu.matmul %7, %8, %cst_8 {dimension_numbers = #tpu.dot_dimension_numbers<[1], [0], [0], [1], [0, 0, 1, 1], [], []>} : vector<8x32xf32>, vector<32x9xf32>, vector<8x9xf32> -> vector<8x9xf32>
    %c0_9 = arith.constant 0 : index
    %c0_10 = arith.constant 0 : index
    %10 = vector.load %arg5[%c0_9, %c0_10] : memref<1x9xf32, #tpu.memory_space<vmem>>, vector<1x9xf32>
    %11 = vector.broadcast %10 : vector<1x9xf32> to vector<8x9xf32>
    %12 = arith.addf %9, %11 : vector<8x9xf32>
    %c0_11 = arith.constant 0 : index
    %c0_12 = arith.constant 0 : index
    %13 = vector.load %arg6[%c0_11, %c0_12] : memref<8x9xf32, #tpu.memory_space<vmem>>, vector<8x9xf32>
    tpu.vector_store %arg6[%c0_11, %c0_12], %12 {strides = array<i32>} : memref<8x9xf32, #tpu.memory_space<vmem>>, vector<8x9xf32>,
    return
  }
  func.func @transform_0(%arg0: i32) -> (i32, i32) {
    %c0_i32 = arith.constant 0 : i32
    %c0_i32_0 = arith.constant 0 : i32
    return %arg0, %c0_i32 : i32, i32
  }
  func.func @transform_1(%arg0: i32) -> (i32, i32) {
    %c0_i32 = arith.constant 0 : i32
    %c0_i32_0 = arith.constant 0 : i32
    %c0_i32_1 = arith.constant 0 : i32
    return %c0_i32, %c0_i32_0 : i32, i32
  }
  func.func @transform_2(%arg0: i32) -> (i32, i32) {
    %c0_i32 = arith.constant 0 : i32
    %c0_i32_0 = arith.constant 0 : i32
    %c0_i32_1 = arith.constant 0 : i32
    return %c0_i32, %c0_i32_0 : i32, i32
  }
  func.func @transform_3(%arg0: i32) -> (i32, i32) {
    %c0_i32 = arith.constant 0 : i32
    %c0_i32_0 = arith.constant 0 : i32
    %c0_i32_1 = arith.constant 0 : i32
    return %c0_i32, %c0_i32_0 : i32, i32
  }
  func.func @transform_4(%arg0: i32) -> (i32, i32) {
    %c0_i32 = arith.constant 0 : i32
    %c0_i32_0 = arith.constant 0 : i32
    %c0_i32_1 = arith.constant 0 : i32
    return %c0_i32, %c0_i32_0 : i32, i32
  }
  func.func @transform_5(%arg0: i32) -> (i32, i32) {
    %c0_i32 = arith.constant 0 : i32
    %c0_i32_0 = arith.constant 0 : i32
    return %arg0, %c0_i32 : i32, i32
  }
}

</mosaic_0001>

<bundles_post_ra>
// kernel: tpu_custom_call.1
= control target key start
LH: loop header
LB: loop body
LE: loop exit
PB: predicated region body
PF: predicated region fallthrough
CT: control target
= control target key end

     0   :  { %v274_v2 = vmov 0.0|0.0   ;;  %vm275_vm0 = vmmov 0   ;;  %v276_v4 = vmov 0.0   ;;  %s347_s0 = inlined_call_operand.vmem [shape: f32[8,16], index: 0, kind: input, shape index: {}]   ;;  %s348_s1 = inlined_call_operand.vmem [shape: f32[16,32], index: 1, kind: input, shape index: {}]   ;;  %s349_s2 = inlined_call_operand.vmem [shape: f32[1,32], index: 2, kind: input, shape index: {}]   ;;  %s350_s3 = inlined_call_operand.vmem [shape: f32[32,9], index: 3, kind: input, shape index: {}]   ;;  %s351_s4 = inlined_call_operand.vmem [shape: f32[1,9], index: 4, kind: input, shape index: {}]   ;;  %s352_s5 = inlined_call_operand.hbm [shape: f32[8,9], index: 5, kind: output, shape index: {}]  }
   0x1   :  { %v22_v0 = vld [vmem:[%s348_s1] sm:$0xff]  ;;  %v23_v1 = vld [vmem:[%s348_s1 + $0x8] sm:$0xff]  ;;  %237 = vmatprep.subr.bf16.mxu0 %v274_v2  ;;  %223 = vmatprep.mubr.msk.f32.mxu0 %vm275_vm0, %v276_v4 }
   0x2   :  { %v238_v3 = vpack.c.bf16 %v23_v1, %v22_v0  ;;  %v106_v5 = vld [vmem:[%s350_s3] sm:$0xff]  ;;  %v107_v6 = vld [vmem:[%s350_s3 + $0x8] sm:$0xff]  ;;  %240 = vmatprep.subr.bf16.mxu1 %v274_v2  ;;  %234 = vmatprep.mubr.msk.f32.mxu1 %vm275_vm0, %v276_v4 }
   0x3   :  { %v241_v7 = vpack.c.bf16 %v107_v6, %v106_v5 }
   0x4   :  { %10 = vsyncpa [#allocation3], 0  ;;  %239 = vmatpush3.bf16.msra.mxu0 %v238_v3  ;;  %v21_v8 = vld [vmem:[%s347_s0] sm:$0xff]  ;;  %vm31_vm1 = vcmask 130048   ;;  %v108_v9 = vld [vmem:[%s350_s3 + $0x10] sm:$0xff]  ;;  %vm117_vm2 = vcmask 261120  }
   0x5   :  { %242 = vmatpush3.bf16.msra.mxu1 %v241_v7  ;;  %v109_v10 = vld [vmem:[%s350_s3 + $0x18] sm:$0xff]  ;;  %v207_v12 = vld [vmem:[%s349_s2] ss:$0 sm:$0xff]  ;;  %s277_s9 = smov [#allocation2]   ;;  %vm191_vm3 = vcmask 72704  }
   0x6   :  { %243 = vmatprep.subr.bf16.mxu1 %v274_v2  ;;  %v244_v11 = vpack.c.bf16 %v109_v10, %v108_v9  ;;  %v209_v17 = vld [vmem:[%s351_s4] ss:$0 sm:$0xff]  ;;  %s199_s10 = sshll.u32 %s277_s9, 4  ;;  %s200_s10 = int_to_ptr.vmem [resolvable:$true] %s199_s10 }
   0x7   :  { %224 = vmatmul.mubr.msk.f32.vlgmr.msra.gmra.mrb[0].mxu0 %vm31_vm1, %v21_v8  ;;  %s250_s3 = scalar_lea.vmem %s200_s10, 128  ;;  %p255_p1 = scmp.lt.s32.totalorder %s200_s10, %s200_s10 }
   0x8   :  { %p251_p0 = scmp.ne.s32.totalorder %s200_s10, %s250_s3  ;;  %p256_p2 = scmp.lt.s32.totalorder %s250_s3, %s250_s3 }
   0x9   :  { %245 = vmatpush3.bf16.msra.mxu1 %v244_v11 }
   0xa   :  { %p257_p3 = por %p256_p2, %p255_p1 }
   0xc   :  { %p258_p4 = pnand %p257_p3, %p251_p0 }
  0xda   :  { %v101_v13 = vpop.f32.mrb[0].mxu0 }
  0xdb   :  { %v102_v14 = vadd.f32 %v207_v12, %v101_v13  ;;  %v225_v15 = vpop.f32.mrb[1].mxu0 }
  0xdd   :  { %v105_v16 = vmax.f32 %v102_v14, 0.0 }
  0xdf   :  { %235 = vmatmul.mubr.msk.f32.vlgmr.msra.gmra.mrb[0].mxu1 %vm117_vm2, %v105_v16 }
 0x1b2   :  { %v187_v18 = vpop.f32.mrb[0].mxu1 }
 0x1b3   :  { %v188_v19 = vadd.f32 %v209_v17, %v187_v18  ;;  %v236_v20 = vpop.f32.mrb[1].mxu1 }
 0x1b5   :  { %192 = vst.msk [vmem:[#allocation2] sm:$0xff] %vm191_vm3, %v188_v19 }
 0x1b6   :  { %261 = shalt.err (!%p258_p4)
}
 0x1b7   :  { %s262_s12 = scalar_lea.hbm %s352_s5, 128 }
 0x1b8   :  { %p263_p5 = scmp.ne.s32.totalorder %s352_s5, %s262_s12  ;;  %p266_p6 = scmp.lt.u32.totalorder %s262_s12, %s352_s5 }
 0x1ba   :  { %p268_p7 = pnand %p266_p6, %p263_p5 }
 0x1bc   :  { %271 = shalt.err (!%p268_p7)
}
 0x1bd   :  { %202 = dma.vmem_to_hbm [thread:$0]  %s200_s10, 128, %s352_s5, [#allocation3]  }
 0x1be   :  { %272 = dma.done.wait [#allocation3], 128  }
 0x1bf   :  { %273 = vsyncadd [#allocation3], 4294967168 }
 0x1c0   :  { %206 = vsyncpa [#allocation3], 1 }

</bundles_post_ra>
